<compile_context>
chip_gen: v5e
topology: v5e:2x2
jax: 0.10.0
libtpu: 0.0.40
codegen_flags: <defaults>
</compile_context>

<pallas_src>
import jax
import jax.numpy as jnp
from jax.experimental import pallas as pl
from jax.experimental.pallas import tpu as pltpu  # noqa: F401  (TPU backend)

LANE = 128


def _build_positional_encoding(num_hiddens: int, max_len: int = 1000) -> jnp.ndarray:
    """Exactly mirrors PositionalEncoding.__init__ (torch formula)."""
    positions = jnp.arange(max_len, dtype=jnp.float32).reshape(-1, 1)
    div = jnp.power(
        10000.0, jnp.arange(0, num_hiddens, 2, dtype=jnp.float32) / num_hiddens
    )
    X = positions / div  # (max_len, ceil(H/2))
    P = jnp.zeros((max_len, num_hiddens), dtype=jnp.float32)
    n_even = num_hiddens // 2 + num_hiddens % 2
    n_odd = num_hiddens // 2
    P = P.at[:, 0::2].set(jnp.sin(X[:, :n_even]))
    P = P.at[:, 1::2].set(jnp.cos(X[:, :n_odd]))
    return P  # (max_len, H)


def _encdec_kernel(
    x_ref,     # (R, H)   f32   R = B*S
    p_ref,     # (R, H)   f32   positional table (tiled per batch)
    w3_ref,    # (3, H, H) bf16  [We, Wdx, Wde]
    wp_ref,    # (H, Op)  bf16  Op = lane-padded O
    bias_ref,  # (3, Op)  f32   rows = [be, bd, bp], lane-padded
    o_ref,     # (R, Op)  f32
):
    R, H = x_ref.shape

    # Positional encoding (dropout == identity in eval mode).  f32 elementwise.
    xp = x_ref[...] + p_ref[...]                                    # (R, H) f32
    xp_bf = xp.astype(jnp.bfloat16)

    # Unpack the bias slab with cheap static slices.
    be = bias_ref[0:1, :H]                                          # (1, H)
    bd = bias_ref[1:2, :H]                                          # (1, H)
    bp = bias_ref[2:3, :]                                           # (1, Op)

    # Encoder: relu(Xp @ We + be)   — bf16 MXU operands, f32 accumulate.
    enc = jnp.dot(xp_bf, w3_ref[0], preferred_element_type=jnp.float32)
    enc = jnp.maximum(enc + be, 0.0)                                # (R, H) f32

    # Decoder: relu(Xp @ Wdx + enc @ Wde + bd)
    # Two dots summed — no lane-axis concatenate (review item #1).
    dec = jnp.dot(xp_bf, w3_ref[1], preferred_element_type=jnp.float32)
    dec = dec + jnp.dot(enc.astype(jnp.bfloat16), w3_ref[2],
                        preferred_element_type=jnp.float32)
    dec = jnp.maximum(dec + bd, 0.0)                                # (R, H) f32

    # Post-decoder: dec @ Wp + bp   (Wp lane-padded -> unmasked full-lane store)
    out = jnp.dot(dec.astype(jnp.bfloat16), wp_ref[...],
                  preferred_element_type=jnp.float32)
    o_ref[...] = (out + bp).astype(o_ref.dtype)                     # (R, Op)


def encoder_decoder_forward(x, params):
    """x: (B, S, H) float32.  params: dict from make_params."""
    B, S, H = x.shape
    O = params["out_dim"]
    rows = B * S
    o_pad = params["bias_pad"].shape[-1]

    # Collapse the batch: every matmul sees B*S rows in one kernel invocation.
    x2 = x.reshape(rows, H)
    # Positional table tiled per batch row (1 KiB at these shapes; at
    # production S pass it untiled and broadcast inside the kernel instead).
    p2 = jnp.tile(params["P"][:S, :], (B, 1))

    # Grid-less call: whole arrays land in VMEM once, no pipeline buffers.
    out = pl.pallas_call(
        _encdec_kernel,
        out_shape=jax.ShapeDtypeStruct((rows, o_pad), jnp.float32),
    )(x2, p2, params["w3_bf"], params["wp_pad_bf"], params["bias_pad"])

    # Slice lane padding off and restore (B, S, O).  (Optionally let the
    # consumer read the lane-padded slab directly to skip this tiny copy.)
    return out[:, :O].reshape(B, S, O)


def make_params(key, hidden, out_dim, max_len=1000, lane=LANE):
    """Deterministic synthetic parameters for the injected sub-modules,
    plus kernel-ready (bf16 / stacked / lane-padded) tensors."""
    ks = jax.random.split(key, 4)
    scale = 1.0 / jnp.sqrt(hidden)
    we = jax.random.normal(ks[0], (hidden, hidden), jnp.float32) * scale
    wdx = jax.random.normal(ks[1], (hidden, hidden), jnp.float32) * scale
    wde = jax.random.normal(ks[2], (hidden, hidden), jnp.float32) * scale
    wp = jax.random.normal(ks[3], (hidden, out_dim), jnp.float32) * scale
    be = jnp.zeros((1, hidden), jnp.float32)
    bd = jnp.zeros((1, hidden), jnp.float32)
    bp = jnp.zeros((1, out_dim), jnp.float32)

    o_pad = max(((out_dim + lane - 1) // lane) * lane, lane)

    # Stacked bf16 weight slab: one DMA instead of three.
    w3_bf = jnp.stack([we, wdx, wde], axis=0).astype(jnp.bfloat16)

    # Lane-padded post-decoder weight (full-lane output stores).
    wp_pad_bf = (
        jnp.zeros((hidden, o_pad), jnp.float32).at[:, :out_dim].set(wp)
    ).astype(jnp.bfloat16)

    # Packed bias slab (3, o_pad): rows = [be, bd, bp], zero lane-padded.
    bias_pad = jnp.zeros((3, o_pad), jnp.float32)
    bias_pad = bias_pad.at[0, :hidden].set(be[0])
    bias_pad = bias_pad.at[1, :hidden].set(bd[0])
    bias_pad = bias_pad.at[2, :out_dim].set(bp[0])

    return {
        "out_dim": out_dim,
        "P": _build_positional_encoding(hidden, max_len),
        # f32 originals (for the reference check)
        "we": we, "wdx": wdx, "wde": wde, "wp": wp,
        "be": be, "bd": bd, "bp": bp,
        # kernel-ready tensors
        "w3_bf": w3_bf,
        "wp_pad_bf": wp_pad_bf,
        "bias_pad": bias_pad,
    }


if __name__ == "__main__":
    # Small shapes consistent with the module: idim = (seq, hidden) = (8, 32).
    B, S, H, O = 2, 8, 32, 16

    key = jax.random.PRNGKey(0)
    k_x, k_p = jax.random.split(key)
    x = jax.random.normal(k_x, (B, S, H), dtype=jnp.float32)
    params = make_params(k_p, H, O)

    y = encoder_decoder_forward(x, params)
    jax.block_until_ready(y)

    # Pure-JAX reference using the same bf16-operand / f32-accumulate math.
    xp = x + params["P"][None, :S, :]
    xp_bf = xp.astype(jnp.bfloat16)
    enc = jnp.maximum(
        jnp.einsum("bsh,hk->bsk", xp_bf, params["we"].astype(jnp.bfloat16),
                   preferred_element_type=jnp.float32) + params["be"], 0.0)
    dec = jnp.maximum(
        jnp.einsum("bsh,hk->bsk", xp_bf, params["wdx"].astype(jnp.bfloat16),
                   preferred_element_type=jnp.float32)
        + jnp.einsum("bsh,hk->bsk", enc.astype(jnp.bfloat16),
                     params["wde"].astype(jnp.bfloat16),
                     preferred_element_type=jnp.float32)
        + params["bd"], 0.0)
    ref = jnp.einsum("bsh,ho->bso", dec.astype(jnp.bfloat16),
                     params["wp"].astype(jnp.bfloat16),
                     preferred_element_type=jnp.float32) + params["bp"]

    assert y.shape == (B, S, O)
    assert jnp.allclose(y, ref, atol=1e-2, rtol=1e-2), "mismatch vs JAX reference"

    print("KERNEL_OK")
</pallas_src>

<mosaic_0001>
module attributes {stable_mosaic.version = 11 : i64} {
  func.func @_encdec_kernel(%arg0: memref<16x32xf32, #tpu.memory_space<vmem>>, %arg1: memref<16x32xf32, #tpu.memory_space<vmem>>, %arg2: memref<3x32x32xbf16, #tpu.memory_space<vmem>>, %arg3: memref<32x128xbf16, #tpu.memory_space<vmem>>, %arg4: memref<3x128xf32, #tpu.memory_space<vmem>>, %arg5: memref<16x128xf32, #tpu.memory_space<vmem>>) attributes {dimension_semantics = [], scalar_prefetch = 0 : i64, scratch_operands = 0 : i64, tpu.core_type = #tpu.core_type<tc>} {
    %c0 = arith.constant 0 : index
    %c0_0 = arith.constant 0 : index
    %0 = vector.load %arg0[%c0, %c0_0] : memref<16x32xf32, #tpu.memory_space<vmem>>, vector<16x32xf32>
    %c0_1 = arith.constant 0 : index
    %c0_2 = arith.constant 0 : index
    %1 = vector.load %arg1[%c0_1, %c0_2] : memref<16x32xf32, #tpu.memory_space<vmem>>, vector<16x32xf32>
    %2 = arith.addf %0, %1 : vector<16x32xf32>
    %3 = arith.truncf %2 : vector<16x32xf32> to vector<16x32xbf16>
    %c0_3 = arith.constant 0 : index
    %c0_4 = arith.constant 0 : index
    %4 = vector.load %arg4[%c0_3, %c0_4] : memref<3x128xf32, #tpu.memory_space<vmem>>, vector<1x32xf32>
    %c1 = arith.constant 1 : index
    %c0_5 = arith.constant 0 : index
    %5 = vector.load %arg4[%c1, %c0_5] : memref<3x128xf32, #tpu.memory_space<vmem>>, vector<1x32xf32>
    %c2 = arith.constant 2 : index
    %c0_6 = arith.constant 0 : index
    %6 = vector.load %arg4[%c2, %c0_6] : memref<3x128xf32, #tpu.memory_space<vmem>>, vector<1x128xf32>
    %c0_7 = arith.constant 0 : index
    %c0_8 = arith.constant 0 : index
    %c0_9 = arith.constant 0 : index
    %7 = vector.load %arg2[%c0_7, %c0_8, %c0_9] : memref<3x32x32xbf16, #tpu.memory_space<vmem>>, vector<1x32x32xbf16>
    %8 = vector.shape_cast %7 : vector<1x32x32xbf16> to vector<32x32xbf16>
    %cst = arith.constant dense<0.000000e+00> : vector<16x32xf32>
    %9 = tpu.matmul %3, %8, %cst {dimension_numbers = #tpu.dot_dimension_numbers<[1], [0], [0], [1], [0, 0, 1, 1], [], []>} : vector<16x32xbf16>, vector<32x32xbf16>, vector<16x32xf32> -> vector<16x32xf32>
    %10 = vector.broadcast %4 : vector<1x32xf32> to vector<16x32xf32>
    %11 = arith.addf %9, %10 : vector<16x32xf32>
    %cst_10 = arith.constant 0.000000e+00 : f32
    %12 = vector.broadcast %cst_10 : f32 to vector<16x32xf32>
    %13 = arith.maximumf %11, %12 : vector<16x32xf32>
    %c1_11 = arith.constant 1 : index
    %c0_12 = arith.constant 0 : index
    %c0_13 = arith.constant 0 : index
    %14 = vector.load %arg2[%c1_11, %c0_12, %c0_13] : memref<3x32x32xbf16, #tpu.memory_space<vmem>>, vector<1x32x32xbf16>
    %15 = vector.shape_cast %14 : vector<1x32x32xbf16> to vector<32x32xbf16>
    %cst_14 = arith.constant dense<0.000000e+00> : vector<16x32xf32>
    %16 = tpu.matmul %3, %15, %cst_14 {dimension_numbers = #tpu.dot_dimension_numbers<[1], [0], [0], [1], [0, 0, 1, 1], [], []>} : vector<16x32xbf16>, vector<32x32xbf16>, vector<16x32xf32> -> vector<16x32xf32>
    %17 = arith.truncf %13 : vector<16x32xf32> to vector<16x32xbf16>
    %c2_15 = arith.constant 2 : index
    %c0_16 = arith.constant 0 : index
    %c0_17 = arith.constant 0 : index
    %18 = vector.load %arg2[%c2_15, %c0_16, %c0_17] : memref<3x32x32xbf16, #tpu.memory_space<vmem>>, vector<1x32x32xbf16>
    %19 = vector.shape_cast %18 : vector<1x32x32xbf16> to vector<32x32xbf16>
    %cst_18 = arith.constant dense<0.000000e+00> : vector<16x32xf32>
    %20 = tpu.matmul %17, %19, %cst_18 {dimension_numbers = #tpu.dot_dimension_numbers<[1], [0], [0], [1], [0, 0, 1, 1], [], []>} : vector<16x32xbf16>, vector<32x32xbf16>, vector<16x32xf32> -> vector<16x32xf32>
    %21 = arith.addf %16, %20 : vector<16x32xf32>
    %22 = vector.broadcast %5 : vector<1x32xf32> to vector<16x32xf32>
    %23 = arith.addf %21, %22 : vector<16x32xf32>
    %cst_19 = arith.constant 0.000000e+00 : f32
    %24 = vector.broadcast %cst_19 : f32 to vector<16x32xf32>
    %25 = arith.maximumf %23, %24 : vector<16x32xf32>
    %26 = arith.truncf %25 : vector<16x32xf32> to vector<16x32xbf16>
    %c0_20 = arith.constant 0 : index
    %c0_21 = arith.constant 0 : index
    %27 = vector.load %arg3[%c0_20, %c0_21] : memref<32x128xbf16, #tpu.memory_space<vmem>>, vector<32x128xbf16>
    %cst_22 = arith.constant dense<0.000000e+00> : vector<16x128xf32>
    %28 = tpu.matmul %26, %27, %cst_22 {dimension_numbers = #tpu.dot_dimension_numbers<[1], [0], [0], [1], [0, 0, 1, 1], [], []>} : vector<16x32xbf16>, vector<32x128xbf16>, vector<16x128xf32> -> vector<16x128xf32>
    %29 = vector.broadcast %6 : vector<1x128xf32> to vector<16x128xf32>
    %30 = arith.addf %28, %29 : vector<16x128xf32>
    %c0_23 = arith.constant 0 : index
    %c0_24 = arith.constant 0 : index
    %31 = vector.load %arg5[%c0_23, %c0_24] : memref<16x128xf32, #tpu.memory_space<vmem>>, vector<16x128xf32>
    tpu.vector_store %arg5[%c0_23, %c0_24], %30 {strides = array<i32>} : memref<16x128xf32, #tpu.memory_space<vmem>>, vector<16x128xf32>,
    return
  }
}

</mosaic_0001>

<bundles_post_ra>
// kernel: tpu_custom_call.1
= control target key start
LH: loop header
LB: loop body
LE: loop exit
PB: predicated region body
PF: predicated region fallthrough
CT: control target
= control target key end

     0   :  { %10 = vsyncpa [#allocation3], 0  ;;  %s554_s0 = inlined_call_operand.hbm [shape: f32[16,32], index: 0, kind: input, shape index: {}]   ;;  %s555_s1 = inlined_call_operand.hbm [shape: f32[16,32], index: 1, kind: input, shape index: {}]   ;;  %s556_s2 = inlined_call_operand.hbm [shape: bf16[3,32,32], index: 2, kind: input, shape index: {}]   ;;  %s557_s3 = inlined_call_operand.hbm [shape: bf16[32,128], index: 3, kind: input, shape index: {}]   ;;  %s558_s4 = inlined_call_operand.hbm [shape: f32[3,128], index: 4, kind: input, shape index: {}]   ;;  %s559_s5 = inlined_call_operand.hbm [shape: f32[16,128], index: 5, kind: output, shape index: {}]  }
   0x1   :  { %11 = vsyncpa [#allocation6], 0 }
   0x2   :  { %12 = vsyncpa [#allocation9], 0 }
   0x3   :  { %13 = vsyncpa [#allocation4], 0  ;;  %s31_s20 = sshll.u32 %s555_s1, 4  ;;  %s483_s21 = smov [#allocation5]   ;;  %s32_s20 = int_to_ptr.hbm [resolvable:$true] %s31_s20 }
   0x4   :  { %s33_s22 = sshll.u32 %s483_s21, 4  ;;  %s484_s23 = smov 128   ;;  %s34_s22 = int_to_ptr.vmem [resolvable:$true] %s33_s22 }
   0x5   :  { %s485_s24 = smov 8   ;;  %s57_s27 = sshll.u32 %s557_s3, 4  ;;  %s58_s27 = int_to_ptr.hbm [resolvable:$true] %s57_s27 }
   0x6   :  { %39 = dma.hbm_to_vmem [thread:$0]  %s32_s20, 256, %s34_s22, [#allocation6], %s484_s23, %s484_s23, %s485_s24  }
   0x7   :  { %s486_s28 = smov [#allocation8]   ;;  %s18_s1 = sshll.u32 %s554_s0, 4  ;;  %s19_s1 = int_to_ptr.hbm [resolvable:$true] %s18_s1 }
   0x8   :  { %s59_s29 = sshll.u32 %s486_s28, 4  ;;  %s487_s7 = smov 64   ;;  %s60_s29 = int_to_ptr.vmem [resolvable:$true] %s59_s29 }
   0x9   :  { %s488_s8 = smov 4   ;;  %s44_s11 = sshll.u32 %s556_s2, 4  ;;  %s45_s11 = int_to_ptr.hbm [resolvable:$true] %s44_s11 }
   0xa   :  { %65 = dma.hbm_to_vmem [thread:$0]  %s58_s27, 256, %s60_s29, [#allocation9], %s487_s7, %s487_s7, %s488_s8  }
   0xb   :  { %s489_s12 = smov [#allocation2]   ;;  %s490_s3 = smov [#allocation7]  }
   0xc   :  { %s20_s13 = sshll.u32 %s489_s12, 4  ;;  %s46_s14 = sshll.u32 %s490_s3, 4  ;;  %s21_s13 = int_to_ptr.vmem [resolvable:$true] %s20_s13  ;;  %s47_s14 = int_to_ptr.vmem [resolvable:$true] %s46_s14 }
   0xd   :  { %26 = dma.hbm_to_vmem [thread:$0]  %s19_s1, 256, %s21_s13, [#allocation3], %s484_s23, %s484_s23, %s485_s24  }
   0xe   :  { %s71_s16 = sshll.u32 %s558_s4, 4  ;;  %s491_s17 = smov [#allocation10]   ;;  %s72_s16 = int_to_ptr.hbm [resolvable:$true] %s71_s16 }
   0xf   :  { %52 = dma.hbm_to_vmem [thread:$0]  %s45_s11, 768, %s47_s14, [#allocation6], %s487_s7, %s487_s7, %s488_s8  }
  0x10   :  { %s73_s18 = sshll.u32 %s491_s17, 4  ;;  %s74_s18 = int_to_ptr.vmem [resolvable:$true] %s73_s18 }
  0x11   :  { %76 = dma.hbm_to_vmem [thread:$0]  %s72_s16, 64, %s74_s18, [#allocation9]  }
  0x12   :  { %475 = dma.done.wait [#allocation3], 256  }
  0x13   :  { %476 = vsyncadd [#allocation3], 4294967040 }
  0x14   :  { %477 = dma.done.wait [#allocation6], 1024  }
  0x15   :  { %478 = vsyncadd [#allocation6], 4294966272 }
  0x16   :  { %479 = dma.done.wait [#allocation9], 320  }
  0x17   :  { %480 = vsyncadd [#allocation9], 4294966976  ;;  %v311_v0 = vld [vmem:[#allocation7 + $0x8] sm:$0xff]  ;;  %v98_v1 = vld [vmem:[#allocation2] sm:$0xff]  ;;  %vm125_vm0 = vcmask 261120   ;;  %s492_s2 = smov [#allocation11]  }
  0x18   :  { %v99_v2 = vld [vmem:[#allocation2 + $0x8] sm:$0xff]  ;;  %v100_v3 = vld [vmem:[#allocation5] sm:$0xff]  ;;  %v101_v4 = vld [vmem:[#allocation5 + $0x8] sm:$0xff]  ;;  %135 = vmatpush.bf16.msra.mxu0 %v311_v0  ;;  %s257_s4 = sshll.u32 %s492_s2, 4  ;;  %s259_s21 = sshll.u32 %s559_s5, 4  ;;  %s258_s4 = int_to_ptr.vmem [resolvable:$true] %s257_s4  ;;  %s260_s21 = int_to_ptr.hbm [resolvable:$true] %s259_s21 }
  0x19   :  { %v310_v5 = vld [vmem:[#allocation7] sm:$0xff]  ;;  %v102_v6 = vadd.f32 %v100_v3, %v98_v1  ;;  %v103_v7 = vadd.f32 %v101_v4, %v99_v2  ;;  %v313_v8 = vld [vmem:[#allocation7 + $0x18] sm:$0xff]  ;;  %v312_v9 = vld [vmem:[#allocation7 + $0x10] sm:$0xff] }
  0x1a   :  { %203 = vmatpush.bf16.msra.mxu2 %v313_v8  ;;  %v315_v11 = vld [vmem:[#allocation7 + $0x28] sm:$0xff]  ;;  %v314_v12 = vld [vmem:[#allocation7 + $0x20] sm:$0xff]  ;;  %v317_v21 = vld [vmem:[#allocation8 + $0x8] sm:$0xff] }
  0x1b   :  { %v104_v10 = vpack.c.bf16 %v103_v7, %v102_v6  ;;  %177 = vmatpush.bf16.msra.mxu1 %v315_v11  ;;  %v328_v14 = vld [vmem:[#allocation10] ss:$0 sm:$0xff]  ;;  %243 = vmatpush.bf16.msra.mxu3 %v317_v21  ;;  %v316_v22 = vld [vmem:[#allocation8] sm:$0xff]  ;;  %v329_v26 = vld [vmem:[#allocation10 + $0x1] ss:$0 sm:$0xff] }
  0x1c   :  { %136 = vmatpush.bf16.msra.mxu0 %v310_v5  ;;  %v330_v35 = vld [vmem:[#allocation10 + $0x2] ss:$0 sm:$0xff] }
  0x1e   :  { %204 = vmatpush.bf16.msra.mxu2 %v312_v9 }
  0x1f   :  { %282 = vmatmul.msk.bf16.vlgmr.msra.gmra.mxu0 %vm125_vm0, %v104_v10  ;;  %178 = vmatpush.bf16.msra.mxu1 %v314_v12 }
  0x20   :  { %244 = vmatpush.bf16.msra.mxu3 %v316_v22 }
  0x21   :  { %300 = vmatmul.msk.bf16.vlgmr.msra.gmra.mxu2 %vm125_vm0, %v104_v10 }
  0x9c   :  { %v138_v13 = vpop.f32.mrf.mxu0 }
  0x9d   :  { %v139_v15 = vadd.f32 %v328_v14, %v138_v13 }
  0x9f   :  { %v143_v18 = vmax.f32 %v139_v15, 0.0 }
  0xa4   :  { %v140_v16 = vpop.f32.mrf.mxu0  ;;  %v206_v23 = vpop.f32.mrf.mxu2 }
  0xa5   :  { %v141_v17 = vadd.f32 %v328_v14, %v140_v16 }
  0xa7   :  { %v144_v19 = vmax.f32 %v141_v17, 0.0 }
  0xa9   :  { %v150_v20 = vpack.c.bf16 %v144_v19, %v143_v18 }
  0xab   :  { %291 = vmatmul.msk.bf16.vlgmr.msra.gmra.mxu1 %vm125_vm0, %v150_v20 }
  0xac   :  { %v208_v27 = vpop.f32.mrf.mxu2 }
 0x128   :  { %v180_v24 = vpop.f32.mrf.mxu1 }
 0x129   :  { %v207_v25 = vadd.f32 %v206_v23, %v180_v24 }
 0x12b   :  { %v212_v29 = vadd.f32 %v329_v26, %v207_v25 }
 0x12d   :  { %v214_v32 = vmax.f32 %v212_v29, 0.0 }
 0x130   :  { %v182_v28 = vpop.f32.mrf.mxu1 }
 0x131   :  { %v209_v30 = vadd.f32 %v208_v27, %v182_v28 }
 0x133   :  { %v213_v31 = vadd.f32 %v329_v26, %v209_v30 }
 0x135   :  { %v215_v33 = vmax.f32 %v213_v31, 0.0 }
 0x137   :  { %v216_v34 = vpack.c.bf16 %v215_v33, %v214_v32 }
 0x139   :  { %309 = vmatmul.msk.bf16.vlgmr.msra.gmra.mxu3 %vm125_vm0, %v216_v34 }
 0x1bc   :  { %v246_v36 = vpop.f32.mrf.mxu3 }
 0x1bd   :  { %v247_v37 = vadd.f32 %v330_v35, %v246_v36 }
 0x1bf   :  { %251 = vst [vmem:[#allocation11] sm:$0xff] %v247_v37 }
 0x1c4   :  { %v248_v38 = vpop.f32.mrf.mxu3 }
 0x1c5   :  { %v249_v39 = vadd.f32 %v330_v35, %v248_v38 }
 0x1c7   :  { %252 = vst [vmem:[#allocation11 + $0x8] sm:$0xff] %v249_v39 }
 0x1c8   :  { %265 = dma.vmem_to_hbm [thread:$0]  %s258_s4, 256, %s260_s21, [#allocation4], %s484_s23, %s484_s23, %s485_s24  }
 0x1c9   :  { %481 = dma.done.wait [#allocation4], 256  }
 0x1ca   :  { %482 = vsyncadd [#allocation4], 4294967040 }
 0x1cb   :  { %270 = vsyncpa [#allocation3], 1 }
 0x1cc   :  { %271 = vsyncpa [#allocation6], 1 }
 0x1cd   :  { %272 = vsyncpa [#allocation9], 1 }
 0x1ce   :  { %273 = vsyncpa [#allocation4], 1 }

</bundles_post_ra>
